<compile_context>
chip_gen: v6e
topology: v6e:2x2x1
jax: 0.10.0
libtpu: 0.0.40
codegen_flags: <defaults>
</compile_context>

<pallas_src>
import jax
import jax.numpy as jnp
from jax.experimental import pallas as pl
from jax.experimental.pallas import tpu as pltpu


def _pick_t_tile(T, max_tile=2048):
    """Largest tile that divides T: T itself if small, else a multiple-of-8 divisor."""
    if T <= max_tile:
        return T
    start = max_tile - (max_tile % 8)
    for cand in range(start, 0, -8):
        if T % cand == 0:
            return cand
    return T  # fallback: single tile covering all of T


def _mlp_kernel(x_ref, sb_ref, w1d_ref, w2_ref, b2_ref, out_ref):
    # x_ref:   (1, t_tile, Dd)   dynamic features for this (batch, t-tile)
    # sb_ref:  (1, 1, H)         static contribution + b1 for this batch elem
    # w1d_ref: (Dd, H), w2_ref: (H, C), b2_ref: (1, C)
    # out_ref: (1, t_tile, C)
    x = x_ref[0]                                               # (t_tile, Dd)
    h = jnp.dot(x, w1d_ref[...], preferred_element_type=jnp.float32) + sb_ref[0]
    h = jnp.maximum(h, 0.0)                                    # ReLU
    out = jnp.dot(h, w2_ref[...], preferred_element_type=jnp.float32) + b2_ref[...]
    out_ref[0] = out.astype(out_ref.dtype)


def naive_model_forward(x_dynamic, x_static, params, *, t_tile=None):
    """x_dynamic: (B, T, Dd) f32, x_static: (B, Ds) f32 -> (B, T, C) f32."""
    w1, b1, w2, b2 = params["w1"], params["b1"], params["w2"], params["b2"]
    B, T, Dd = x_dynamic.shape
    Ds = x_static.shape[1]
    H = w1.shape[1]
    C = w2.shape[1]
    assert w1.shape[0] == Ds + Dd

    # Split W1 along the concat axis (static columns come first in the torch
    # concat). Static contribution + b1 folded into a per-batch bias. This is
    # a tiny (B,Ds)@(Ds,H) matmul; fine to leave in the wrapper.
    w1_static = w1[:Ds]            # (Ds, H)
    w1_dyn = w1[Ds:]               # (Dd, H)
    static_bias = (x_static @ w1_static + b1).reshape(B, 1, H)  # (B, 1, H)

    b2_2d = b2.reshape(1, C)

    if t_tile is None:
        t_tile = _pick_t_tile(T)
    assert T % t_tile == 0
    grid = (B, T // t_tile)

    flops = 2 * B * T * (Dd * H + H * C) + B * T * (H + C)
    bytes_accessed = 4 * (B * T * Dd + B * H + Dd * H + H * C + C + B * T * C)

    out = pl.pallas_call(
        _mlp_kernel,
        out_shape=jax.ShapeDtypeStruct((B, T, C), jnp.float32),
        grid_spec=pltpu.PrefetchScalarGridSpec(
            num_scalar_prefetch=0,
            grid=grid,
            in_specs=[
                pl.BlockSpec((1, t_tile, Dd), lambda b, t: (b, t, 0)),  # x_dynamic
                pl.BlockSpec((1, 1, H), lambda b, t: (b, 0, 0)),        # static bias
                pl.BlockSpec((Dd, H), lambda b, t: (0, 0)),             # W1_dyn
                pl.BlockSpec((H, C), lambda b, t: (0, 0)),              # W2
                pl.BlockSpec((1, C), lambda b, t: (0, 0)),              # b2
            ],
            out_specs=pl.BlockSpec((1, t_tile, C), lambda b, t: (b, t, 0)),
        ),
        compiler_params=pltpu.CompilerParams(
            dimension_semantics=("parallel", "parallel")),
        cost_estimate=pl.CostEstimate(
            flops=flops, transcendentals=0, bytes_accessed=bytes_accessed),
    )(x_dynamic, static_bias, w1_dyn, w2, b2_2d)

    return out


def reference_forward(x_dynamic, x_static, params, num_timesteps):
    """Pure-JAX reference mirroring the PyTorch forward."""
    x_stat_rep = jnp.repeat(x_static[:, None, :], num_timesteps, axis=1)
    x = jnp.concatenate([x_stat_rep, x_dynamic], axis=2)
    h = jnp.maximum(x @ params["w1"] + params["b1"], 0.0)
    return h @ params["w2"] + params["b2"]


if __name__ == "__main__":
    # Small shapes consistent with the module's forward.
    B = 2                 # batch
    T = 5                 # num_timesteps (module default)
    Ds = 8                # static feature dim
    Dd = 24               # dynamic feature dim
    input_dim = Ds + Dd   # dense1 input_dim
    H = 64                # dense1 hidden size (module fixed)
    C = 15                # num_classes (module default)

    key = jax.random.PRNGKey(0)
    k_xd, k_xs, k_w1, k_b1, k_w2, k_b2 = jax.random.split(key, 6)

    x_dynamic = jax.random.normal(k_xd, (B, T, Dd), dtype=jnp.float32)
    x_static = jax.random.normal(k_xs, (B, Ds), dtype=jnp.float32)

    # Deterministic parameter init (synthetic; shapes follow nn.Linear).
    params = {
        "w1": jax.random.normal(k_w1, (input_dim, H), dtype=jnp.float32) * 0.05,
        "b1": jax.random.normal(k_b1, (H,), dtype=jnp.float32) * 0.05,
        "w2": jax.random.normal(k_w2, (H, C), dtype=jnp.float32) * 0.05,
        "b2": jax.random.normal(k_b2, (C,), dtype=jnp.float32) * 0.05,
    }

    out = naive_model_forward(x_dynamic, x_static, params)
    out = jax.block_until_ready(out)

    ref = reference_forward(x_dynamic, x_static, params, T)
    assert out.shape == (B, T, C)
    # Split-K (static/dynamic W1 split) changes summation order slightly;
    # stays well within f32 tolerance.
    assert jnp.allclose(out, ref, atol=1e-5, rtol=1e-5)

    print("KERNEL_OK")
</pallas_src>

<mosaic_0001>
module attributes {stable_mosaic.version = 11 : i64} {
  func.func @_mlp_kernel(%arg0: i32, %arg1: i32, %arg2: memref<1x5x24xf32, #tpu.memory_space<vmem>>, %arg3: memref<1x1x64xf32, #tpu.memory_space<vmem>>, %arg4: memref<24x64xf32, #tpu.memory_space<vmem>>, %arg5: memref<64x15xf32, #tpu.memory_space<vmem>>, %arg6: memref<1x15xf32, #tpu.memory_space<vmem>>, %arg7: memref<1x5x15xf32, #tpu.memory_space<vmem>>) attributes {dimension_semantics = [#tpu.dimension_semantics<parallel>, #tpu.dimension_semantics<parallel>], iteration_bounds = array<i64: 2, 1>, scalar_prefetch = 0 : i64, scratch_operands = 0 : i64, tpu.core_type = #tpu.core_type<tc>, window_params = [{transform_indices = @transform_0, window_bounds = array<i64: 1, 5, 24>}, {transform_indices = @transform_1, window_bounds = array<i64: 1, 1, 64>}, {pipeline_mode = #tpu.pipeline_mode<synchronous>, transform_indices = @transform_2, window_bounds = array<i64: 24, 64>}, {pipeline_mode = #tpu.pipeline_mode<synchronous>, transform_indices = @transform_3, window_bounds = array<i64: 64, 15>}, {pipeline_mode = #tpu.pipeline_mode<synchronous>, transform_indices = @transform_4, window_bounds = array<i64: 1, 15>}, {transform_indices = @transform_5, window_bounds = array<i64: 1, 5, 15>}]} {
    %c0 = arith.constant 0 : index
    %c0_0 = arith.constant 0 : index
    %c0_1 = arith.constant 0 : index
    %0 = vector.load %arg2[%c0, %c0_0, %c0_1] : memref<1x5x24xf32, #tpu.memory_space<vmem>>, vector<1x5x24xf32>
    %1 = vector.shape_cast %0 : vector<1x5x24xf32> to vector<5x24xf32>
    %c0_2 = arith.constant 0 : index
    %c0_3 = arith.constant 0 : index
    %2 = vector.load %arg4[%c0_2, %c0_3] : memref<24x64xf32, #tpu.memory_space<vmem>>, vector<24x64xf32>
    %cst = arith.constant dense<0.000000e+00> : vector<5x64xf32>
    %3 = tpu.matmul %1, %2, %cst {dimension_numbers = #tpu.dot_dimension_numbers<[1], [0], [0], [1], [0, 0, 1, 1], [], []>} : vector<5x24xf32>, vector<24x64xf32>, vector<5x64xf32> -> vector<5x64xf32>
    %c0_4 = arith.constant 0 : index
    %c0_5 = arith.constant 0 : index
    %c0_6 = arith.constant 0 : index
    %4 = vector.load %arg3[%c0_4, %c0_5, %c0_6] : memref<1x1x64xf32, #tpu.memory_space<vmem>>, vector<1x1x64xf32>
    %5 = vector.shape_cast %4 : vector<1x1x64xf32> to vector<1x64xf32>
    %6 = vector.broadcast %5 : vector<1x64xf32> to vector<5x64xf32>
    %7 = arith.addf %3, %6 : vector<5x64xf32>
    %cst_7 = arith.constant 0.000000e+00 : f32
    %8 = vector.broadcast %cst_7 : f32 to vector<5x64xf32>
    %9 = arith.maximumf %7, %8 : vector<5x64xf32>
    %c0_8 = arith.constant 0 : index
    %c0_9 = arith.constant 0 : index
    %10 = vector.load %arg5[%c0_8, %c0_9] : memref<64x15xf32, #tpu.memory_space<vmem>>, vector<64x15xf32>
    %cst_10 = arith.constant dense<0.000000e+00> : vector<5x15xf32>
    %11 = tpu.matmul %9, %10, %cst_10 {dimension_numbers = #tpu.dot_dimension_numbers<[1], [0], [0], [1], [0, 0, 1, 1], [], []>} : vector<5x64xf32>, vector<64x15xf32>, vector<5x15xf32> -> vector<5x15xf32>
    %c0_11 = arith.constant 0 : index
    %c0_12 = arith.constant 0 : index
    %12 = vector.load %arg6[%c0_11, %c0_12] : memref<1x15xf32, #tpu.memory_space<vmem>>, vector<1x15xf32>
    %13 = vector.broadcast %12 : vector<1x15xf32> to vector<5x15xf32>
    %14 = arith.addf %11, %13 : vector<5x15xf32>
    %c0_13 = arith.constant 0 : index
    %c0_14 = arith.constant 0 : index
    %c0_15 = arith.constant 0 : index
    %15 = vector.load %arg7[%c0_13, %c0_14, %c0_15] : memref<1x5x15xf32, #tpu.memory_space<vmem>>, vector<1x5x15xf32>
    %16 = vector.shape_cast %15 : vector<1x5x15xf32> to vector<5x15xf32>
    %17 = vector.shape_cast %14 : vector<5x15xf32> to vector<1x5x15xf32>
    tpu.vector_store %arg7[%c0_13, %c0_14, %c0_15], %17 {strides = array<i32>} : memref<1x5x15xf32, #tpu.memory_space<vmem>>, vector<1x5x15xf32>,
    return
  }
  func.func @transform_0(%arg0: i32, %arg1: i32) -> (i32, i32, i32) {
    %c0_i32 = arith.constant 0 : i32
    %c0_i32_0 = arith.constant 0 : i32
    return %arg0, %arg1, %c0_i32 : i32, i32, i32
  }
  func.func @transform_1(%arg0: i32, %arg1: i32) -> (i32, i32, i32) {
    %c0_i32 = arith.constant 0 : i32
    %c0_i32_0 = arith.constant 0 : i32
    %c0_i32_1 = arith.constant 0 : i32
    return %arg0, %c0_i32, %c0_i32_0 : i32, i32, i32
  }
  func.func @transform_2(%arg0: i32, %arg1: i32) -> (i32, i32) {
    %c0_i32 = arith.constant 0 : i32
    %c0_i32_0 = arith.constant 0 : i32
    %c0_i32_1 = arith.constant 0 : i32
    return %c0_i32, %c0_i32_0 : i32, i32
  }
  func.func @transform_3(%arg0: i32, %arg1: i32) -> (i32, i32) {
    %c0_i32 = arith.constant 0 : i32
    %c0_i32_0 = arith.constant 0 : i32
    %c0_i32_1 = arith.constant 0 : i32
    return %c0_i32, %c0_i32_0 : i32, i32
  }
  func.func @transform_4(%arg0: i32, %arg1: i32) -> (i32, i32) {
    %c0_i32 = arith.constant 0 : i32
    %c0_i32_0 = arith.constant 0 : i32
    %c0_i32_1 = arith.constant 0 : i32
    return %c0_i32, %c0_i32_0 : i32, i32
  }
  func.func @transform_5(%arg0: i32, %arg1: i32) -> (i32, i32, i32) {
    %c0_i32 = arith.constant 0 : i32
    %c0_i32_0 = arith.constant 0 : i32
    return %arg0, %arg1, %c0_i32 : i32, i32, i32
  }
}

</mosaic_0001>

<bundles_post_ra>
// kernel: tpu_custom_call.1
= control target key start
LH: loop header
LB: loop body
LE: loop exit
PB: predicated region body
PF: predicated region fallthrough
CT: control target
= control target key end

     0   :  { %s661_s18 = smov 0   ;;  %s663_s19 = smov 0   ;;  %s743_s0 = inlined_call_operand.vmem [shape: f32[2,5,24], index: 0, kind: input, shape index: {}]   ;;  %s744_s1 = inlined_call_operand.vmem [shape: f32[2,1,64], index: 1, kind: input, shape index: {}]   ;;  %s745_s2 = inlined_call_operand.vmem [shape: f32[24,64], index: 2, kind: input, shape index: {}]   ;;  %s746_s3 = inlined_call_operand.vmem [shape: f32[64,15], index: 3, kind: input, shape index: {}]   ;;  %s747_s4 = inlined_call_operand.vmem [shape: f32[1,15], index: 4, kind: input, shape index: {}]   ;;  %s748_s5 = inlined_call_operand.vmem [shape: f32[2,5,15], index: 5, kind: output, shape index: {}]  }
   0x1   :  { %s665_s20 = smov 0  }
   0x2 LB: > { %s27_s21 = sadd.s32 1, %s623_s19  ;;  %p529_p0 = scmp.ge.s32.totalorder %s627_s20, 1  ;;  %s627_s20 = sphi %s665_s20, %s15_s20   ;;  %s623_s19 = sphi %s663_s19, %s750_s19   ;;  %s619_s18 = sphi %s661_s18, %s749_s18  }
   0x3   : > { %p29_p1 = scmp.ge.s32.totalorder %s27_s21, 2  ;;  %p213_p2 = scmp.lt.s32.totalorder %s627_s20, 3 }
   0x5   : > { %s752_s21 = smov (%p29_p1, %s27_s21), 0  ;;  %p214_p3 = pnand %p529_p0, %p213_p2 }
   0x6   : > { %p248_p4 = scmp.lt.s32.totalorder (!%p214_p3), %s619_s18, 1 }
   0x7   : > { %217 = sbr.rel (%p214_p3) target bundleno = 412 (0x19c), region = 40 }
   0xc   : > { %v268_v0 = vld [vmem:[%s745_s2 + $0x10] sm:$0xff]  ;;  %v629_v1 = vmov 0.0   ;;  %v267_v2 = vld [vmem:[%s745_s2 + $0x8] sm:$0xff]  ;;  %vm630_vm0 = vmmov 0   ;;  %v358_v3 = vld [vmem:[%s746_s3 + $0x38] sm:$0xff]  ;;  %s754_s18 = smov (!%p248_p4, %s619_s18), 1 }
   0xd   : > { %551 = vmatprep.subr.mxu0 %v629_v1  ;;  %557 = vmatprep.mubr.msk.f32.mxu0 %vm630_vm0, %v629_v1  ;;  %v357_v4 = vld [vmem:[%s746_s3 + $0x30] sm:$0xff]  ;;  %v266_v5 = vld [vmem:[%s745_s2] sm:$0xff]  ;;  %s530_s7 = sshll.u32 %s754_s18, 3  ;;  %vm276_vm1 = vcmask 195584   ;;  %v356_v6 = vld [vmem:[%s746_s3 + $0x28] sm:$0xff]  ;;  %s257_s29 = scalar_lea.vmem %s744_s1, %s754_s18  ;;  %vm366_vm2 = vcmask 523264  }
   0xe   : > { %552 = vmatpush3.msra.mxu0 %v268_v0  ;;  %560 = vmatprep.subr.mxu1 %v629_v1  ;;  %s254_s12 = scalar_lea.vmem %s743_s0, %s530_s7  ;;  %v355_v8 = vld [vmem:[%s746_s3 + $0x20] sm:$0xff]  ;;  %v354_v9 = vld [vmem:[%s746_s3 + $0x18] sm:$0xff]  ;;  %v353_v10 = vld [vmem:[%s746_s3 + $0x10] sm:$0xff]  ;;  %s264_s10 = scalar_lea.vmem %s748_s5, %s530_s7  ;;  %vm440_vm3 = vcmask 118784  }
   0xf   : > { %553 = vmatprep.subr.mxu0 %v629_v1  ;;  %561 = vmatpush3.msra.mxu1 %v358_v3  ;;  %v265_v7 = vld [vmem:[%s254_s12] sm:$0x1f]  ;;  %v352_v11 = vld [vmem:[%s746_s3 + $0x8] sm:$0xff] }
  0x10   : > { %554 = vmatpush3.msra.mxu0 %v267_v2  ;;  %562 = vmatprep.subr.mxu1 %v629_v1  ;;  %v351_v12 = vld [vmem:[%s746_s3] sm:$0xff] }
  0x11   : > { %555 = vmatprep.subr.mxu0 %v629_v1  ;;  %563 = vmatpush3.msra.mxu1 %v357_v4  ;;  %v532_v13 = vld [vmem:[%s257_s29] ss:$0 sm:$0xff] }
  0x12   : > { %556 = vmatpush3.msra.mxu0 %v266_v5  ;;  %564 = vmatprep.subr.mxu1 %v629_v1  ;;  %v534_v18 = vld [vmem:[%s747_s4] ss:$0 sm:$0xff] }
  0x13   : > { %558 = vmatmul.mubr.msk.f32.vlgmr.msra.gmra.mxu0 %vm276_vm1, %v265_v7  ;;  %565 = vmatpush3.msra.mxu1 %v356_v6 }
  0x14   : > { %566 = vmatprep.subr.mxu1 %v629_v1  ;;  %576 = vmatprep.mubr.msk.f32.mxu1 %vm630_vm0, %v629_v1 }
  0x15   : > { %567 = vmatpush3.msra.mxu1 %v355_v8 }
  0x16   : > { %568 = vmatprep.subr.mxu1 %v629_v1 }
  0x17   : > { %569 = vmatpush3.msra.mxu1 %v354_v9 }
  0x18   : > { %570 = vmatprep.subr.mxu1 %v629_v1 }
  0x19   : > { %571 = vmatpush3.msra.mxu1 %v353_v10 }
  0x1a   : > { %572 = vmatprep.subr.mxu1 %v629_v1 }
  0x1b   : > { %573 = vmatpush3.msra.mxu1 %v352_v11 }
  0x1c   : > { %574 = vmatprep.subr.mxu1 %v629_v1 }
  0x1d   : > { %575 = vmatpush3.msra.mxu1 %v351_v12 }
  0xd3   : > { %v346_v14 = vpop.f32.mrf.mxu0 }
  0xd4   : > { %v347_v15 = vadd.f32 %v532_v13, %v346_v14 }
  0xd5   : > { %v559_v16 = vpop.f32.mrf.mxu0 }
  0xd6   : > { %v350_v17 = vmax.f32 %v347_v15, 0.0 }
  0xd8   : > { %577 = vmatmul.mubr.msk.f32.vlgmr.msra.gmra.mxu1 %vm366_vm2, %v350_v17 }
 0x198   : > { %v436_v19 = vpop.f32.mrf.mxu1 }
 0x199   : > { %v437_v20 = vadd.f32 %v534_v18, %v436_v19 }
 0x19a   : > { %v578_v21 = vpop.f32.mrf.mxu1 }
 0x19b   : > { %441 = vst.msk [vmem:[%s264_s10] sm:$0x1f] %vm440_vm3, %v437_v20 }
 0x19c PF: > { %s15_s20 = sadd.s32 1, %s627_s20   ;;  %s749_s18 = smov %s623_s19 }
 0x19d   : > { %p12_p5 = scmp.ge.s32.totalorder %s15_s20, 4   ;;  %s750_s19 = smov %s752_s21 }
 0x19f   :  { %14 = sbr.rel (!%p12_p5) target bundleno = 2 (0x2), region = 73 }

</bundles_post_ra>
